<compile_context>
chip_gen: v5e
topology: v5e:2x2
jax: 0.10.0
libtpu: 0.0.40
codegen_flags: <defaults>
</compile_context>

<pallas_src>
from functools import partial

import jax
import jax.numpy as jnp
from jax.experimental import pallas as pl
from jax.experimental.pallas import tpu as pltpu

ALPHA = 1.0            # module default alpha
LANES = 128
MAX_BLOCK_ROWS = 2048  # (2048, 128) f32 tile = 1 MiB per input stream
NUM_CORES = 2          # v7x has 2 TensorCores; harmless on 1-TC chips


def _lovasz_stats_kernel(x_ref, y_ref, out_ref, acc_ref, *, alpha, rows,
                         block_rows, steps_per_core, total_blocks):
    """Accumulates per-lane partial sums into acc_ref of shape (32, 128):
       rows [ 0: 8): sum(errors)   (errors = 1 + elu(x*(2y-1), alpha))
       rows [ 8:16): sum(x)
       rows [16:24): sum(y)
       rows [24:32): sum(x*y)
    The per-core accumulator is written to out_ref on the core's last step."""
    c = pl.program_id(0)               # "parallel" core-split axis
    i = pl.program_id(1)               # "arbitrary" reduction axis
    gb = c * steps_per_core + i        # global row-block index (may be phantom)

    @pl.when(i == 0)
    def _init():
        acc_ref[...] = jnp.zeros_like(acc_ref)

    def accumulate(x, y, valid=None):
        xy = x * y
        z = xy + xy - x                # == x * (2y - 1), reuses the xy product
        err = 1.0 + jnp.where(z > 0.0, z, alpha * (jnp.exp(z) - 1.0))
        if valid is not None:          # only on the (single) partial block
            err = jnp.where(valid, err, 0.0)
        for k, v in enumerate((err, x, y, xy)):
            if block_rows % 8 == 0:
                # Reduce block_rows -> 8 sublanes: pure vreg adds, and the
                # accumulator update is an unmasked (8,128) read-modify-write.
                part = v.reshape(block_rows // 8, 8, LANES).sum(axis=0)
                acc_ref[8 * k:8 * (k + 1), :] += part
            else:
                acc_ref[8 * k:8 * k + 1, :] += v.sum(axis=0, keepdims=True)

    full_blocks = total_blocks if rows % block_rows == 0 else total_blocks - 1

    if full_blocks > 0:
        @pl.when(gb < full_blocks)      # fast path: no masking at all
        def _full():
            accumulate(x_ref[...].astype(jnp.float32),
                       y_ref[...].astype(jnp.float32))

    if rows % block_rows != 0:
        tail_rows = rows - (total_blocks - 1) * block_rows

        @pl.when(gb == total_blocks - 1)  # masked path: only the partial block
        def _tail():
            rowid = jax.lax.broadcasted_iota(jnp.int32, (block_rows, LANES), 0)
            valid = rowid < tail_rows
            x = jnp.where(valid, x_ref[...].astype(jnp.float32), 0.0)
            y = jnp.where(valid, y_ref[...].astype(jnp.float32), 0.0)
            accumulate(x, y, valid)

    # Phantom steps (gb >= total_blocks, only when total_blocks is odd) fall
    # through both `pl.when`s and contribute nothing.

    @pl.when(i == steps_per_core - 1)
    def _write():
        out_ref[...] = acc_ref[...]


def _partial_sums(x2d, y2d, alpha):
    """Run the kernel on the lane-dense (rows, 128) bulk; return 4 f32 sums."""
    rows = x2d.shape[0]
    block_rows = min(rows, MAX_BLOCK_ROWS)
    total_blocks = pl.cdiv(rows, block_rows)
    cores = NUM_CORES if total_blocks >= NUM_CORES else 1
    steps_per_core = pl.cdiv(total_blocks, cores)

    def in_map(c, i):
        # Clamp so a phantom step (odd block count) re-reads the last block;
        # its contribution is skipped inside the kernel.
        return (jnp.minimum(c * steps_per_core + i, total_blocks - 1), 0)

    tile_spec = pl.BlockSpec((block_rows, LANES), in_map)
    bytes_in = rows * LANES * (x2d.dtype.itemsize + y2d.dtype.itemsize)

    out = pl.pallas_call(
        partial(_lovasz_stats_kernel, alpha=float(alpha), rows=rows,
                block_rows=block_rows, steps_per_core=steps_per_core,
                total_blocks=total_blocks),
        out_shape=jax.ShapeDtypeStruct((cores, 32, LANES), jnp.float32),
        grid=(cores, steps_per_core),
        in_specs=[tile_spec, tile_spec],
        out_specs=pl.BlockSpec((None, 32, LANES), lambda c, i: (c, 0, 0)),
        scratch_shapes=[pltpu.VMEM((32, LANES), jnp.float32)],
        compiler_params=pltpu.CompilerParams(
            dimension_semantics=("parallel", "arbitrary"),
            vmem_limit_bytes=32 * 1024 * 1024),
        cost_estimate=pl.CostEstimate(
            flops=12 * rows * LANES,
            transcendentals=rows * LANES,
            bytes_accessed=int(bytes_in) + cores * 32 * LANES * 4),
    )(x2d, y2d)

    sums = out.reshape(cores, 4, 8, LANES).sum(axis=(0, 2, 3))
    return sums[0], sums[1], sums[2], sums[3]


def modified_lovasz_loss(logits, labels, alpha=ALPHA):
    x = logits.reshape(-1)                 # free (row-major flatten)
    y = labels.reshape(-1)
    if y.dtype == jnp.bool_:
        y = y.astype(jnp.int8)             # bool refs are awkward in Mosaic; 1 B/elem
    n = x.shape[0]
    nf = jnp.float32(n)
    rows = n // LANES
    tail = n - rows * LANES

    s_err = jnp.float32(0.0)
    s_x = jnp.float32(0.0)
    s_y = jnp.float32(0.0)
    s_xy = jnp.float32(0.0)

    if rows > 0:
        # Lane-dense (rows, 128) view; zero-copy when n % 128 == 0. Otherwise
        # only the <128-element tail is peeled off below (no jnp.pad pass).
        x_main = (x if tail == 0 else x[: rows * LANES]).reshape(rows, LANES)
        y_main = (y if tail == 0 else y[: rows * LANES]).reshape(rows, LANES)
        e, sx, sy, sxy = _partial_sums(x_main, y_main, alpha)
        s_err += e
        s_x += sx
        s_y += sy
        s_xy += sxy

    if tail > 0:
        xt = x[rows * LANES:].astype(jnp.float32)
        yt = y[rows * LANES:].astype(jnp.float32)
        xyt = xt * yt
        zt = xyt + xyt - xt
        errt = 1.0 + jnp.where(zt > 0.0, zt, alpha * (jnp.exp(zt) - 1.0))
        s_err += errt.sum()
        s_x += xt.sum()
        s_y += yt.sum()
        s_xy += xyt.sum()

    # dice-surrogate stats of both hinge branches, derived algebraically.
    tp1 = s_xy
    fp1 = s_x - s_xy
    fn1 = s_y - s_xy
    tp2 = s_xy - s_x              # sum((-x) * (1 - y))
    fp2 = -s_xy                   # sum((-x) * y)
    fn2 = nf - s_y + s_x - s_xy   # sum((1 + x) * (1 - y))

    def hinge(tp, fp, fn):
        numerator = 2.0 * tp
        denominator = 2.0 * tp + fp + fn
        d_denominator = 2.0 + (fp - fn) / (tp + 1e-6)
        grad = (2.0 / (denominator + 1e-6)
                - numerator / (denominator + 1e-6) ** 2 * d_denominator)
        # grad is a scalar -> losses.mean() == grad * mean(errors)
        return grad * (s_err / nf)

    return (hinge(tp1, fp1, fn1) + hinge(tp2, fp2, fn2)) / 2.0


def _reference(logits, labels, alpha=ALPHA):
    """Pure-JAX transcription of the PyTorch module (including the sort)."""
    x = logits.reshape(-1).astype(jnp.float32)
    y = labels.reshape(-1).astype(jnp.float32)

    def lovasz_hinge(x, y):
        z = x * (2.0 * y - 1.0)
        errors = 1.0 + jnp.where(z > 0, z, alpha * (jnp.exp(z) - 1.0))
        errors_sorted = jnp.sort(errors)[::-1]           # descending
        tp = jnp.sum(x * y)
        fp = jnp.sum(x * (1.0 - y))
        fn = jnp.sum((1.0 - x) * y)
        numerator = 2.0 * tp
        denominator = 2.0 * tp + fp + fn
        d_denominator = 2.0 + (fp - fn) / (tp + 1e-6)
        grad = (2.0 / (denominator + 1e-6)
                - numerator / (denominator + 1e-6) ** 2 * d_denominator)
        return jnp.mean(grad * errors_sorted)

    return (lovasz_hinge(x, y) + lovasz_hinge(-x, 1.0 - y)) / 2.0


if __name__ == "__main__":
    key = jax.random.PRNGKey(0)

    def check(logits, labels, rtol=3e-4, atol=3e-5):
        loss = jax.block_until_ready(modified_lovasz_loss(logits, labels))
        ref = jax.block_until_ready(
            _reference(logits.astype(jnp.float32), labels.astype(jnp.float32)))
        assert jnp.allclose(loss, ref, rtol=rtol, atol=atol), (loss, ref)

    # 1) Canonical small case (n % 128 == 0, single block, unmasked fast path).
    k1, k2 = jax.random.split(key)
    logits = jax.random.normal(k1, (2, 4, 16, 16), dtype=jnp.float32)
    labels = jax.random.bernoulli(k2, 0.5, (2, 4, 16, 16)).astype(jnp.float32)
    check(logits, labels)

    # 2) Native narrow dtypes straight into the kernel (bf16 logits, int8 labels).
    check(logits.astype(jnp.bfloat16), labels.astype(jnp.int8))

    # 3) n % 128 != 0 -> <128-element tail peeled off in the wrapper (no pad copy).
    k3, k4 = jax.random.split(k1)
    logits3 = jax.random.normal(k3, (2, 1, 21, 21), dtype=jnp.float32)
    labels3 = jax.random.bernoulli(k4, 0.5, (2, 1, 21, 21)).astype(jnp.float32)
    check(logits3, labels3)

    # 4) Multi-block input -> 2-way 'parallel' split + in-kernel masked last block.
    k5, k6 = jax.random.split(k2)
    logits4 = jax.random.normal(k5, (1, 1, 2050, 128), dtype=jnp.float32)
    labels4 = jax.random.bernoulli(k6, 0.5, (1, 1, 2050, 128)).astype(jnp.float32)
    check(logits4, labels4)

    print("KERNEL_OK")
</pallas_src>

<mosaic_0001>
module attributes {stable_mosaic.version = 11 : i64} {
  func.func @_lovasz_stats_kernel(%arg0: i32, %arg1: i32, %arg2: memref<16x128xf32, #tpu.memory_space<vmem>>, %arg3: memref<16x128xf32, #tpu.memory_space<vmem>>, %arg4: memref<1x32x128xf32, #tpu.memory_space<vmem>>, %arg5: memref<32x128xf32, #tpu.memory_space<vmem>>) attributes {dimension_semantics = [#tpu.dimension_semantics<parallel>, #tpu.dimension_semantics<arbitrary>], iteration_bounds = array<i64: 1, 1>, scalar_prefetch = 0 : i64, scratch_operands = 1 : i64, tpu.core_type = #tpu.core_type<tc>, window_params = [{transform_indices = @transform_0, window_bounds = array<i64: 16, 128>}, {transform_indices = @transform_1, window_bounds = array<i64: 16, 128>}, {transform_indices = @transform_2, window_bounds = array<i64: 1, 32, 128>}]} {
    %c1_i32 = arith.constant 1 : i32
    %0 = arith.muli %arg0, %c1_i32 : i32
    %1 = arith.addi %0, %arg1 : i32
    %c0_i32 = arith.constant 0 : i32
    %2 = arith.cmpi eq, %arg1, %c0_i32 : i32
    %3 = arith.extui %2 : i1 to i32
    %c0_i32_0 = arith.constant 0 : i32
    %4 = arith.cmpi ne, %3, %c0_i32_0 : i32
    scf.if %4 {
      %cst = arith.constant 0.000000e+00 : f32
      %11 = vector.broadcast %cst : f32 to vector<32x128xf32>
      %c0 = arith.constant 0 : index
      %c0_5 = arith.constant 0 : index
      %12 = vector.load %arg5[%c0, %c0_5] : memref<32x128xf32, #tpu.memory_space<vmem>>, vector<32x128xf32>
      tpu.vector_store %arg5[%c0, %c0_5], %11 {strides = array<i32>} : memref<32x128xf32, #tpu.memory_space<vmem>>, vector<32x128xf32>,
    } else {
    }
    %c1_i32_1 = arith.constant 1 : i32
    %5 = arith.cmpi slt, %1, %c1_i32_1 : i32
    %6 = arith.extui %5 : i1 to i32
    %c0_i32_2 = arith.constant 0 : i32
    %7 = arith.cmpi ne, %6, %c0_i32_2 : i32
    scf.if %7 {
      %c0 = arith.constant 0 : index
      %c0_5 = arith.constant 0 : index
      %11 = vector.load %arg2[%c0, %c0_5] : memref<16x128xf32, #tpu.memory_space<vmem>>, vector<16x128xf32>
      %c0_6 = arith.constant 0 : index
      %c0_7 = arith.constant 0 : index
      %12 = vector.load %arg3[%c0_6, %c0_7] : memref<16x128xf32, #tpu.memory_space<vmem>>, vector<16x128xf32>
      %13 = arith.mulf %11, %12 : vector<16x128xf32>
      %14 = arith.addf %13, %13 : vector<16x128xf32>
      %15 = arith.subf %14, %11 : vector<16x128xf32>
      %cst = arith.constant 0.000000e+00 : f32
      %16 = vector.broadcast %cst : f32 to vector<16x128xf32>
      %17 = arith.cmpf ogt, %15, %16 : vector<16x128xf32>
      %18 = math.exp %15 : vector<16x128xf32>
      %cst_8 = arith.constant 1.000000e+00 : f32
      %19 = vector.broadcast %cst_8 : f32 to vector<16x128xf32>
      %20 = arith.subf %18, %19 : vector<16x128xf32>
      %cst_9 = arith.constant 1.000000e+00 : f32
      %21 = vector.broadcast %cst_9 : f32 to vector<16x128xf32>
      %22 = arith.mulf %21, %20 : vector<16x128xf32>
      %23 = arith.select %17, %15, %22 : vector<16x128xi1>, vector<16x128xf32>
      %cst_10 = arith.constant 1.000000e+00 : f32
      %24 = vector.broadcast %cst_10 : f32 to vector<16x128xf32>
      %25 = arith.addf %24, %23 : vector<16x128xf32>
      %26 = vector.shape_cast %25 : vector<16x128xf32> to vector<2x8x128xf32>
      %cst_11 = arith.constant dense<0.000000e+00> : vector<8x128xf32>
      %27 = vector.multi_reduction <add>, %26, %cst_11 [0] : vector<2x8x128xf32> to vector<8x128xf32>
      %c0_12 = arith.constant 0 : index
      %c0_13 = arith.constant 0 : index
      %28 = vector.load %arg5[%c0_12, %c0_13] : memref<32x128xf32, #tpu.memory_space<vmem>>, vector<8x128xf32>
      %29 = arith.addf %28, %27 : vector<8x128xf32>
      %c0_14 = arith.constant 0 : index
      %c0_15 = arith.constant 0 : index
      %30 = vector.load %arg5[%c0_14, %c0_15] : memref<32x128xf32, #tpu.memory_space<vmem>>, vector<8x128xf32>
      tpu.vector_store %arg5[%c0_14, %c0_15], %29 {strides = array<i32>} : memref<32x128xf32, #tpu.memory_space<vmem>>, vector<8x128xf32>,
      %31 = vector.shape_cast %11 : vector<16x128xf32> to vector<2x8x128xf32>
      %cst_16 = arith.constant dense<0.000000e+00> : vector<8x128xf32>
      %32 = vector.multi_reduction <add>, %31, %cst_16 [0] : vector<2x8x128xf32> to vector<8x128xf32>
      %c8 = arith.constant 8 : index
      %c0_17 = arith.constant 0 : index
      %33 = vector.load %arg5[%c8, %c0_17] : memref<32x128xf32, #tpu.memory_space<vmem>>, vector<8x128xf32>
      %34 = arith.addf %33, %32 : vector<8x128xf32>
      %c8_18 = arith.constant 8 : index
      %c0_19 = arith.constant 0 : index
      %35 = vector.load %arg5[%c8_18, %c0_19] : memref<32x128xf32, #tpu.memory_space<vmem>>, vector<8x128xf32>
      tpu.vector_store %arg5[%c8_18, %c0_19], %34 {strides = array<i32>} : memref<32x128xf32, #tpu.memory_space<vmem>>, vector<8x128xf32>,
      %36 = vector.shape_cast %12 : vector<16x128xf32> to vector<2x8x128xf32>
      %cst_20 = arith.constant dense<0.000000e+00> : vector<8x128xf32>
      %37 = vector.multi_reduction <add>, %36, %cst_20 [0] : vector<2x8x128xf32> to vector<8x128xf32>
      %c16 = arith.constant 16 : index
      %c0_21 = arith.constant 0 : index
      %38 = vector.load %arg5[%c16, %c0_21] : memref<32x128xf32, #tpu.memory_space<vmem>>, vector<8x128xf32>
      %39 = arith.addf %38, %37 : vector<8x128xf32>
      %c16_22 = arith.constant 16 : index
      %c0_23 = arith.constant 0 : index
      %40 = vector.load %arg5[%c16_22, %c0_23] : memref<32x128xf32, #tpu.memory_space<vmem>>, vector<8x128xf32>
      tpu.vector_store %arg5[%c16_22, %c0_23], %39 {strides = array<i32>} : memref<32x128xf32, #tpu.memory_space<vmem>>, vector<8x128xf32>,
      %41 = vector.shape_cast %13 : vector<16x128xf32> to vector<2x8x128xf32>
      %cst_24 = arith.constant dense<0.000000e+00> : vector<8x128xf32>
      %42 = vector.multi_reduction <add>, %41, %cst_24 [0] : vector<2x8x128xf32> to vector<8x128xf32>
      %c24 = arith.constant 24 : index
      %c0_25 = arith.constant 0 : index
      %43 = vector.load %arg5[%c24, %c0_25] : memref<32x128xf32, #tpu.memory_space<vmem>>, vector<8x128xf32>
      %44 = arith.addf %43, %42 : vector<8x128xf32>
      %c24_26 = arith.constant 24 : index
      %c0_27 = arith.constant 0 : index
      %45 = vector.load %arg5[%c24_26, %c0_27] : memref<32x128xf32, #tpu.memory_space<vmem>>, vector<8x128xf32>
      tpu.vector_store %arg5[%c24_26, %c0_27], %44 {strides = array<i32>} : memref<32x128xf32, #tpu.memory_space<vmem>>, vector<8x128xf32>,
    } else {
    }
    %c0_i32_3 = arith.constant 0 : i32
    %8 = arith.cmpi eq, %arg1, %c0_i32_3 : i32
    %9 = arith.extui %8 : i1 to i32
    %c0_i32_4 = arith.constant 0 : i32
    %10 = arith.cmpi ne, %9, %c0_i32_4 : i32
    scf.if %10 {
      %c0 = arith.constant 0 : index
      %c0_5 = arith.constant 0 : index
      %11 = vector.load %arg5[%c0, %c0_5] : memref<32x128xf32, #tpu.memory_space<vmem>>, vector<32x128xf32>
      %c0_6 = arith.constant 0 : index
      %c0_7 = arith.constant 0 : index
      %c0_8 = arith.constant 0 : index
      %12 = vector.load %arg4[%c0_6, %c0_7, %c0_8] : memref<1x32x128xf32, #tpu.memory_space<vmem>>, vector<1x32x128xf32>
      %13 = vector.shape_cast %12 : vector<1x32x128xf32> to vector<32x128xf32>
      %14 = vector.shape_cast %11 : vector<32x128xf32> to vector<1x32x128xf32>
      tpu.vector_store %arg4[%c0_6, %c0_7, %c0_8], %14 {strides = array<i32>} : memref<1x32x128xf32, #tpu.memory_space<vmem>>, vector<1x32x128xf32>,
    } else {
    }
    return
  }
  func.func @transform_0(%arg0: i32, %arg1: i32) -> (i32, i32) {
    %c1_i32 = arith.constant 1 : i32
    %0 = arith.muli %arg0, %c1_i32 : i32
    %1 = arith.addi %0, %arg1 : i32
    %c0_i32 = arith.constant 0 : i32
    %2 = arith.minsi %1, %c0_i32 : i32
    %c0_i32_0 = arith.constant 0 : i32
    %c0_i32_1 = arith.constant 0 : i32
    return %2, %c0_i32_0 : i32, i32
  }
  func.func @transform_1(%arg0: i32, %arg1: i32) -> (i32, i32) {
    %c1_i32 = arith.constant 1 : i32
    %0 = arith.muli %arg0, %c1_i32 : i32
    %1 = arith.addi %0, %arg1 : i32
    %c0_i32 = arith.constant 0 : i32
    %2 = arith.minsi %1, %c0_i32 : i32
    %c0_i32_0 = arith.constant 0 : i32
    %c0_i32_1 = arith.constant 0 : i32
    return %2, %c0_i32_0 : i32, i32
  }
  func.func @transform_2(%arg0: i32, %arg1: i32) -> (i32, i32, i32) {
    %c0_i32 = arith.constant 0 : i32
    %c0_i32_0 = arith.constant 0 : i32
    %c0_i32_1 = arith.constant 0 : i32
    return %arg0, %c0_i32, %c0_i32_0 : i32, i32, i32
  }
}

</mosaic_0001>

<bundles_post_ra>
// kernel: tpu_custom_call.1
= control target key start
LH: loop header
LB: loop body
LE: loop exit
PB: predicated region body
PF: predicated region fallthrough
CT: control target
= control target key end

     0   :  { %7 = vsyncpa [#allocation4], 0  ;;  %s277_s0 = inlined_call_operand.hbm [shape: f32[16,128], index: 0, kind: input, shape index: {}]   ;;  %s278_s1 = inlined_call_operand.hbm [shape: f32[16,128], index: 1, kind: input, shape index: {}]   ;;  %s279_s2 = inlined_call_operand.hbm [shape: f32[1,32,128], index: 2, kind: output, shape index: {}]  }
   0x1   :  { %8 = vsyncpa [#allocation7], 0 }
   0x2   :  { %9 = vsyncpa [#allocation5], 0  ;;  %s20_s11 = sshll.u32 %s277_s0, 4  ;;  %s239_s12 = smov [#allocation3]   ;;  %s21_s11 = int_to_ptr.hbm [resolvable:$true] %s20_s11 }
   0x3   :  { %s22_s13 = sshll.u32 %s239_s12, 4  ;;  %s39_s16 = sshll.u32 %s278_s1, 4  ;;  %s23_s13 = int_to_ptr.vmem [resolvable:$true] %s22_s13  ;;  %s40_s16 = int_to_ptr.hbm [resolvable:$true] %s39_s16 }
   0x4   :  { %s240_s17 = smov 128   ;;  %s241_s18 = smov 8  }
   0x5   :  { %28 = dma.hbm_to_vmem [thread:$0]  %s21_s11, 256, %s23_s13, [#allocation4], %s240_s17, %s240_s17, %s241_s18  }
   0x6   :  { %s242_s19 = smov [#allocation6]  }
   0x7   :  { %s41_s20 = sshll.u32 %s242_s19, 4  ;;  %s42_s20 = int_to_ptr.vmem [resolvable:$true] %s41_s20 }
   0x8   :  { %47 = dma.hbm_to_vmem [thread:$0]  %s40_s16, 256, %s42_s20, [#allocation7], %s240_s17, %s240_s17, %s241_s18  }
   0x9   :  { %233 = dma.done.wait [#allocation4], 256  }
   0xa   :  { %234 = vsyncadd [#allocation4], 4294967040 }
   0xb   :  { %235 = dma.done.wait [#allocation7], 256  }
   0xc   :  { %236 = vsyncadd [#allocation7], 4294967040  ;;  %v77_v0 = vld [vmem:[#allocation3] sm:$0xff]  ;;  %v78_v1 = vld [vmem:[#allocation3 + $0x8] sm:$0xff]  ;;  %s243_s0 = smov [#allocation8]   ;;  %s132_s23 = sshll.u32 %s279_s2, 4  ;;  %s133_s23 = int_to_ptr.hbm [resolvable:$true] %s132_s23 }
   0xd   :  { %v79_v2 = vld [vmem:[#allocation6] sm:$0xff]  ;;  %v80_v3 = vld [vmem:[#allocation6 + $0x8] sm:$0xff]  ;;  %v103_v5 = vadd.f32 %v78_v1, %v77_v0  ;;  %s130_s1 = sshll.u32 %s243_s0, 4  ;;  %s131_s1 = int_to_ptr.vmem [resolvable:$true] %s130_s1 }
   0xe   :  { %v81_v4 = vmul.f32 %v79_v2, %v77_v0  ;;  %v82_v6 = vmul.f32 %v80_v3, %v78_v1  ;;  %v107_v7 = vadd.f32 %v80_v3, %v79_v2 }
   0xf   :  { %123 = vst [vmem:[#allocation8 + $0x8] sm:$0xff] %v103_v5 }
  0x10   :  { %v83_v8 = vadd.f32 %v81_v4, %v81_v4  ;;  %v84_v9 = vadd.f32 %v82_v6, %v82_v6  ;;  %124 = vst [vmem:[#allocation8 + $0x10] sm:$0xff] %v107_v7  ;;  %v111_v10 = vadd.f32 %v82_v6, %v81_v4 }
  0x12   :  { %v85_v11 = vsub.f32 %v83_v8, %v77_v0  ;;  %v86_v12 = vsub.f32 %v84_v9, %v78_v1  ;;  %125 = vst [vmem:[#allocation8 + $0x18] sm:$0xff] %v111_v10 }
  0x14   :  { %v89_v13 = vmul.f32 1.442695, %v85_v11  ;;  %v91_v14 = vmul.f32 1.442695, %v86_v12  ;;  %vm87_vm0 = vcmp.gt.f32.partialorder %v85_v11, 0.0  ;;  %vm88_vm1 = vcmp.gt.f32.partialorder %v86_v12, 0.0 }
  0x16   :  { %157 = vpow2.f32 %v89_v13 }
  0x17   :  { %159 = vpow2.f32 %v91_v14 }
  0x1c   :  { %v158_v15 = vpop.eup %157 }
  0x1d   :  { %v160_v16 = vpop.eup %159  ;;  %v150_v17 = vadd.f32 -1.0, %v158_v15 }
  0x1e   :  { %v151_v18 = vadd.f32 -1.0, %v160_v16 }
  0x1f   :  { %v95_v19 = vsel %vm87_vm0, %v85_v11, %v150_v17 }
  0x20   :  { %v96_v20 = vsel %vm88_vm1, %v86_v12, %v151_v18  ;;  %v97_v21 = vadd.f32 1.0, %v95_v19 }
  0x21   :  { %v98_v22 = vadd.f32 1.0, %v96_v20 }
  0x23   :  { %v99_v23 = vadd.f32 %v98_v22, %v97_v21 }
  0x25   :  { %122 = vst [vmem:[#allocation8] sm:$0xff] %v99_v23 }
  0x26   :  { %138 = dma.vmem_to_hbm [thread:$0]  %s131_s1, 512, %s133_s23, [#allocation5], %s240_s17, %s240_s17, %s241_s18  }
  0x27   :  { %237 = dma.done.wait [#allocation5], 512  }
  0x28   :  { %238 = vsyncadd [#allocation5], 4294966784 }
  0x29   :  { %143 = vsyncpa [#allocation4], 1 }
  0x2a   :  { %144 = vsyncpa [#allocation7], 1 }
  0x2b   :  { %145 = vsyncpa [#allocation5], 1 }

</bundles_post_ra>
